<compile_context>
chip_gen: v5e
topology: v5e:2x2
jax: 0.10.0
libtpu: 0.0.40
codegen_flags: <defaults>
</compile_context>

<pallas_src>
import functools
import math

import jax
import jax.numpy as jnp
from jax import lax
from jax.experimental import pallas as pl
from jax.experimental.pallas import tpu as pltpu


def _largest_divisor_leq(n: int, target: int) -> int:
    target = max(1, min(n, target))
    for c in range(target, 0, -1):
        if n % c == 0:
            return c
    return 1


def _mha_kernel(x_ref, mask_ref, wq_ref, wk_ref, wv_ref,
                bq_ref, bk_ref, bv_ref, out_ref, k_scr, v_scr, *,
                num_heads: int, head_dim: int, q_tile: int):
    """One (batch_block, query_tile) grid step.

    x_ref    : (BB, L, Hin)  activations, full sequence block (input dtype)
    mask_ref : (BB, 1, L)    f32 key mask (1 = attend, 0 = masked)
    w*_ref   : (Hin, H)      bf16 projection weights (1/sqrt(d) folded into wq)
    b*_ref   : (1, H)        f32 biases (1/sqrt(d) folded into bq)
    out_ref  : (BB, TQ, H)   output block
    k_scr/v_scr : (BB*L, H)  bf16 VMEM scratch holding K / V projections
    """
    BB, L, Hin = x_ref.shape
    TQ = q_tile
    d = head_dim
    H_out = out_ref.shape[-1]
    qt = pl.program_id(1)

    # ---- K/V projections: once per batch block (first query tile) ----------
    @pl.when(qt == 0)
    def _project_kv():
        x2 = x_ref[...].reshape(BB * L, Hin).astype(jnp.bfloat16)
        k = jnp.dot(x2, wk_ref[...], preferred_element_type=jnp.float32) + bk_ref[...]
        v = jnp.dot(x2, wv_ref[...], preferred_element_type=jnp.float32) + bv_ref[...]
        k_scr[...] = k.astype(jnp.bfloat16)
        v_scr[...] = v.astype(jnp.bfloat16)

    # ---- Q projection for this query tile (scale already folded in) --------
    if TQ == L:
        xq = x_ref[...]
    else:
        start = pl.multiple_of(qt * TQ, TQ)
        xq = x_ref[:, pl.ds(start, TQ), :]
    xq = xq.reshape(BB * TQ, Hin).astype(jnp.bfloat16)
    q = jnp.dot(xq, wq_ref[...], preferred_element_type=jnp.float32) + bq_ref[...]
    q = q.astype(jnp.bfloat16)                                    # (BB*TQ, H)

    # additive key-mask bias, f32, hoisted out of the head loops
    neg_bias = (1.0 - mask_ref[...]) * (-10000.0)                 # (BB, 1, L)

    # store per-head contexts in >=128-lane groups (avoid masked vst)
    hpg = max(1, min(num_heads, 128 // d)) if d < 128 else 1
    while num_heads % hpg != 0:
        hpg -= 1

    for b in range(BB):                                           # static unroll
        qb = q[b * TQ:(b + 1) * TQ, :]                            # (TQ, H) bf16
        kb = k_scr[b * L:(b + 1) * L, :]                          # (L, H)  bf16
        vb = v_scr[b * L:(b + 1) * L, :]                          # (L, H)  bf16
        bias_b = neg_bias[b]                                      # (1, L)  f32

        for g in range(num_heads // hpg):
            parts = []
            for hh in range(hpg):
                h = g * hpg + hh
                lo = h * d
                qh = qb[:, lo:lo + d]
                kh = kb[:, lo:lo + d]
                vh = vb[:, lo:lo + d]
                # scores = q_scaled @ k^T  (bf16 operands, f32 accumulation)
                s = lax.dot_general(qh, kh, (((1,), (1,)), ((), ())),
                                    preferred_element_type=jnp.float32)  # (TQ, L)
                s = s + bias_b
                # numerically-stable softmax over keys, all in f32
                s = s - jnp.max(s, axis=-1, keepdims=True)
                p = jnp.exp(s)
                p = p * pl.reciprocal(jnp.sum(p, axis=-1, keepdims=True),
                                      approx=True)
                # TODO(synk): training-mode dropout on attention probs omitted.
                parts.append(jnp.dot(p.astype(jnp.bfloat16), vh,
                                     preferred_element_type=jnp.float32))
            grp = parts[0] if hpg == 1 else jnp.concatenate(parts, axis=-1)
            col = g * hpg * d
            if hpg * d == H_out:
                out_ref[b] = grp.astype(out_ref.dtype)
            else:
                out_ref[b, :, col:col + hpg * d] = grp.astype(out_ref.dtype)


def multi_head_attention(query, key, value, key_mask,
                         wq, bq, wk, bk, wv, bv, *, num_heads: int):
    """Pallas forward of MultiHeadAttentionLayer (eval mode).

    query/key/value : (B, L, H)
    key_mask        : (B, 1, 1, L)  (1 = attend, 0 = padding)
    wq/wk/wv        : (H, H) in PyTorch nn.Linear layout (out_features, in_features)
    bq/bk/bv        : (H,)
    """
    B, L, H = query.shape
    assert H % num_heads == 0
    d = H // num_heads
    scale = 1.0 / math.sqrt(d)
    out_dtype = query.dtype

    # ---- one-time weight packing (do at model-load time in production) -----
    # 1/sqrt(d) is folded into the query projection so the (L, L) score matrix
    # is never rescaled.
    wq_t = (wq.T * scale).astype(jnp.float32)
    wk_t = wk.T.astype(jnp.float32)
    wv_t = wv.T.astype(jnp.float32)
    bq_s = (bq * scale).astype(jnp.float32)

    if query is key and key is value:
        # Self-attention (the BERT case): the input is streamed once per batch
        # block and all three projections read the same VMEM-resident block.
        x_in = query
        wq_in, wk_in, wv_in = wq_t, wk_t, wv_t
    else:
        # Cross-attention fallback: concatenate the inputs on the feature axis
        # and zero-pad the weights so the same single-input kernel applies
        # (correctness path; the fused self-attention path is the fast one).
        assert key.shape == query.shape and value.shape == query.shape
        x_in = jnp.concatenate([query, key, value], axis=-1)       # (B, L, 3H)
        z = jnp.zeros((H, H), jnp.float32)
        wq_in = jnp.concatenate([wq_t, z, z], axis=0)              # (3H, H)
        wk_in = jnp.concatenate([z, wk_t, z], axis=0)
        wv_in = jnp.concatenate([z, z, wv_t], axis=0)
    Hin = x_in.shape[-1]

    # bf16 weights -> single-pass MXU, half the weight DMA / VMEM residency.
    wq_in = wq_in.astype(jnp.bfloat16)
    wk_in = wk_in.astype(jnp.bfloat16)
    wv_in = wv_in.astype(jnp.bfloat16)
    bq_in = bq_s.reshape(1, H)
    bk_in = bk.reshape(1, H).astype(jnp.float32)
    bv_in = bv.reshape(1, H).astype(jnp.float32)
    mask = key_mask.reshape(B, 1, L).astype(jnp.float32)

    # ---- grid sizing --------------------------------------------------------
    # Tiny L: block several batch elements per step (lane/sublane density,
    # fewer ~0.35us pipeline steps).  Long L: tile queries so per-head (TQ, L)
    # scores stay small and there are enough steps to pipeline / feed 2 TCs.
    bb_target = 1 if L >= 128 else max(1, 128 // max(L, 1))
    BB = _largest_divisor_leq(B, bb_target)
    if BB == 1 and L > 512 and L % 256 == 0 and H % 128 == 0:
        TQ = 256
    else:
        TQ = L
    grid = (B // BB, L // TQ)

    x_spec = pl.BlockSpec((BB, L, Hin), lambda b, t: (b, 0, 0))   # constant in t
    m_spec = pl.BlockSpec((BB, 1, L), lambda b, t: (b, 0, 0))
    w_spec = pl.BlockSpec((Hin, H), lambda b, t: (0, 0))          # resident
    b_spec = pl.BlockSpec((1, H), lambda b, t: (0, 0))
    o_spec = pl.BlockSpec((BB, TQ, H), lambda b, t: (b, t, 0))

    # Conservative VMEM budget (double-buffered blocks + scratch + live
    # intermediates); set explicitly so big configs don't trip the 16/32 MiB
    # scoped defaults, capped below v7x's 64 MiB physical VMEM.
    block_bytes = (
        2 * BB * L * Hin * x_in.dtype.itemsize            # x blocks
        + 2 * BB * L * 4                                  # mask
        + 2 * 3 * Hin * H * 2                             # bf16 weights
        + 2 * 3 * H * 4                                   # biases
        + 2 * BB * TQ * H * jnp.dtype(out_dtype).itemsize # out blocks
        + 2 * BB * L * H * 2                              # K/V scratch
        + 4 * BB * TQ * max(H, L) * 4)                    # live intermediates
    vmem_limit = int(min(max(2 * block_bytes, 32 * 1024 * 1024),
                         56 * 1024 * 1024))

    kernel = functools.partial(_mha_kernel, num_heads=num_heads,
                               head_dim=d, q_tile=TQ)
    out = pl.pallas_call(
        kernel,
        out_shape=jax.ShapeDtypeStruct((B, L, H), out_dtype),
        grid=grid,
        in_specs=[x_spec, m_spec, w_spec, w_spec, w_spec,
                  b_spec, b_spec, b_spec],
        out_specs=o_spec,
        scratch_shapes=[pltpu.VMEM((BB * L, H), jnp.bfloat16),
                        pltpu.VMEM((BB * L, H), jnp.bfloat16)],
        compiler_params=pltpu.CompilerParams(
            dimension_semantics=("parallel", "arbitrary"),
            vmem_limit_bytes=vmem_limit),
    )(x_in, mask, wq_in, wk_in, wv_in, bq_in, bk_in, bv_in)
    return out


def _reference(query, key, value, key_mask, wq, bq, wk, bk, wv, bv, num_heads):
    """Pure-JAX mirror of MultiHeadAttentionLayer.forward (eval mode, f32)."""
    B, L, H = query.shape
    d = H // num_heads
    q = jnp.dot(query, wq.T) + bq
    k = jnp.dot(key, wk.T) + bk
    v = jnp.dot(value, wv.T) + bv

    def split(x):
        return x.reshape(B, L, num_heads, d).transpose(0, 2, 1, 3)

    q, k, v = split(q), split(k), split(v)
    scores = jnp.einsum('bhqd,bhkd->bhqk', q, k) / math.sqrt(d)
    scores = scores + (1.0 - key_mask) * (-10000.0)
    probs = jax.nn.softmax(scores, axis=-1)
    ctx = jnp.einsum('bhqk,bhkd->bhqd', probs, v)
    return ctx.transpose(0, 2, 1, 3).reshape(B, L, H)


if __name__ == "__main__":
    B, S, HIDDEN, NUM_HEADS = 2, 8, 32, 4
    INIT_RANGE = 0.02

    root = jax.random.PRNGKey(0)
    kx, kq2, kk2, kv2, kwq, kwk, kwv, kbq, kbk, kbv = jax.random.split(root, 10)

    x = jax.random.normal(kx, (B, S, HIDDEN), jnp.float32)

    # key_mask: [B, 1, 1, S]; 1 = attend, 0 = padding
    lengths = jnp.array([S, 5], dtype=jnp.int32)
    key_mask = (jnp.arange(S)[None, :] < lengths[:, None]).astype(jnp.float32)
    key_mask = key_mask.reshape(B, 1, 1, S)

    # Weights in PyTorch nn.Linear layout (out_features, in_features)
    wq = INIT_RANGE * jax.random.normal(kwq, (HIDDEN, HIDDEN), jnp.float32)
    wk = INIT_RANGE * jax.random.normal(kwk, (HIDDEN, HIDDEN), jnp.float32)
    wv = INIT_RANGE * jax.random.normal(kwv, (HIDDEN, HIDDEN), jnp.float32)
    bq = INIT_RANGE * jax.random.normal(kbq, (HIDDEN,), jnp.float32)
    bk = INIT_RANGE * jax.random.normal(kbk, (HIDDEN,), jnp.float32)
    bv = INIT_RANGE * jax.random.normal(kbv, (HIDDEN,), jnp.float32)

    # 1) self-attention (BERT usage): query is key is value -> fused fast path
    out_self = multi_head_attention(x, x, x, key_mask,
                                    wq, bq, wk, bk, wv, bv, num_heads=NUM_HEADS)
    out_self = jax.block_until_ready(out_self)
    ref_self = _reference(x, x, x, key_mask, wq, bq, wk, bk, wv, bv, NUM_HEADS)
    assert out_self.shape == (B, S, HIDDEN)
    err_self = float(jnp.max(jnp.abs(out_self - ref_self)))
    assert err_self < 1e-2, f"self-attention mismatch: max abs err = {err_self}"

    # 2) cross-attention (distinct query/key/value) -> general fallback path
    q_in = jax.random.normal(kq2, (B, S, HIDDEN), jnp.float32)
    k_in = jax.random.normal(kk2, (B, S, HIDDEN), jnp.float32)
    v_in = jax.random.normal(kv2, (B, S, HIDDEN), jnp.float32)
    out_x = multi_head_attention(q_in, k_in, v_in, key_mask,
                                 wq, bq, wk, bk, wv, bv, num_heads=NUM_HEADS)
    out_x = jax.block_until_ready(out_x)
    ref_x = _reference(q_in, k_in, v_in, key_mask, wq, bq, wk, bk, wv, bv, NUM_HEADS)
    err_x = float(jnp.max(jnp.abs(out_x - ref_x)))
    assert err_x < 1e-2, f"cross-attention mismatch: max abs err = {err_x}"

    print("KERNEL_OK")
</pallas_src>

<mosaic_0001>
module attributes {stable_mosaic.version = 11 : i64} {
  func.func @_mha_kernel(%arg0: i32, %arg1: i32, %arg2: memref<2x8x32xf32, #tpu.memory_space<vmem>>, %arg3: memref<2x1x8xf32, #tpu.memory_space<vmem>>, %arg4: memref<32x32xbf16, #tpu.memory_space<vmem>>, %arg5: memref<32x32xbf16, #tpu.memory_space<vmem>>, %arg6: memref<32x32xbf16, #tpu.memory_space<vmem>>, %arg7: memref<1x32xf32, #tpu.memory_space<vmem>>, %arg8: memref<1x32xf32, #tpu.memory_space<vmem>>, %arg9: memref<1x32xf32, #tpu.memory_space<vmem>>, %arg10: memref<2x8x32xf32, #tpu.memory_space<vmem>>, %arg11: memref<16x32xbf16, #tpu.memory_space<vmem>>, %arg12: memref<16x32xbf16, #tpu.memory_space<vmem>>) attributes {dimension_semantics = [#tpu.dimension_semantics<parallel>, #tpu.dimension_semantics<arbitrary>], iteration_bounds = array<i64: 1, 1>, scalar_prefetch = 0 : i64, scratch_operands = 2 : i64, tpu.core_type = #tpu.core_type<tc>, window_params = [{transform_indices = @transform_0, window_bounds = array<i64: 2, 8, 32>}, {transform_indices = @transform_1, window_bounds = array<i64: 2, 1, 8>}, {pipeline_mode = #tpu.pipeline_mode<synchronous>, transform_indices = @transform_2, window_bounds = array<i64: 32, 32>}, {pipeline_mode = #tpu.pipeline_mode<synchronous>, transform_indices = @transform_3, window_bounds = array<i64: 32, 32>}, {pipeline_mode = #tpu.pipeline_mode<synchronous>, transform_indices = @transform_4, window_bounds = array<i64: 32, 32>}, {pipeline_mode = #tpu.pipeline_mode<synchronous>, transform_indices = @transform_5, window_bounds = array<i64: 1, 32>}, {pipeline_mode = #tpu.pipeline_mode<synchronous>, transform_indices = @transform_6, window_bounds = array<i64: 1, 32>}, {pipeline_mode = #tpu.pipeline_mode<synchronous>, transform_indices = @transform_7, window_bounds = array<i64: 1, 32>}, {transform_indices = @transform_8, window_bounds = array<i64: 2, 8, 32>}]} {
    %c0_i32 = arith.constant 0 : i32
    %0 = arith.cmpi eq, %arg1, %c0_i32 : i32
    %1 = arith.extui %0 : i1 to i32
    %c0_i32_0 = arith.constant 0 : i32
    %2 = arith.cmpi ne, %1, %c0_i32_0 : i32
    scf.if %2 {
      %c0_56 = arith.constant 0 : index
      %c0_57 = arith.constant 0 : index
      %c0_58 = arith.constant 0 : index
      %179 = vector.load %arg2[%c0_56, %c0_57, %c0_58] : memref<2x8x32xf32, #tpu.memory_space<vmem>>, vector<2x8x32xf32>
      %180 = vector.shape_cast %179 : vector<2x8x32xf32> to vector<16x32xf32>
      %181 = arith.truncf %180 : vector<16x32xf32> to vector<16x32xbf16>
      %c0_59 = arith.constant 0 : index
      %c0_60 = arith.constant 0 : index
      %182 = vector.load %arg5[%c0_59, %c0_60] : memref<32x32xbf16, #tpu.memory_space<vmem>>, vector<32x32xbf16>
      %cst_61 = arith.constant dense<0.000000e+00> : vector<16x32xf32>
      %183 = tpu.matmul %181, %182, %cst_61 {dimension_numbers = #tpu.dot_dimension_numbers<[1], [0], [0], [1], [0, 0, 1, 1], [], []>} : vector<16x32xbf16>, vector<32x32xbf16>, vector<16x32xf32> -> vector<16x32xf32>
      %c0_62 = arith.constant 0 : index
      %c0_63 = arith.constant 0 : index
      %184 = vector.load %arg8[%c0_62, %c0_63] : memref<1x32xf32, #tpu.memory_space<vmem>>, vector<1x32xf32>
      %185 = vector.broadcast %184 : vector<1x32xf32> to vector<16x32xf32>
      %186 = arith.addf %183, %185 : vector<16x32xf32>
      %c0_64 = arith.constant 0 : index
      %c0_65 = arith.constant 0 : index
      %187 = vector.load %arg6[%c0_64, %c0_65] : memref<32x32xbf16, #tpu.memory_space<vmem>>, vector<32x32xbf16>
      %cst_66 = arith.constant dense<0.000000e+00> : vector<16x32xf32>
      %188 = tpu.matmul %181, %187, %cst_66 {dimension_numbers = #tpu.dot_dimension_numbers<[1], [0], [0], [1], [0, 0, 1, 1], [], []>} : vector<16x32xbf16>, vector<32x32xbf16>, vector<16x32xf32> -> vector<16x32xf32>
      %c0_67 = arith.constant 0 : index
      %c0_68 = arith.constant 0 : index
      %189 = vector.load %arg9[%c0_67, %c0_68] : memref<1x32xf32, #tpu.memory_space<vmem>>, vector<1x32xf32>
      %190 = vector.broadcast %189 : vector<1x32xf32> to vector<16x32xf32>
      %191 = arith.addf %188, %190 : vector<16x32xf32>
      %192 = arith.truncf %186 : vector<16x32xf32> to vector<16x32xbf16>
      %c0_69 = arith.constant 0 : index
      %c0_70 = arith.constant 0 : index
      %193 = vector.load %arg11[%c0_69, %c0_70] : memref<16x32xbf16, #tpu.memory_space<vmem>>, vector<16x32xbf16>
      tpu.vector_store %arg11[%c0_69, %c0_70], %192 {strides = array<i32>} : memref<16x32xbf16, #tpu.memory_space<vmem>>, vector<16x32xbf16>,
      %194 = arith.truncf %191 : vector<16x32xf32> to vector<16x32xbf16>
      %c0_71 = arith.constant 0 : index
      %c0_72 = arith.constant 0 : index
      %195 = vector.load %arg12[%c0_71, %c0_72] : memref<16x32xbf16, #tpu.memory_space<vmem>>, vector<16x32xbf16>
      tpu.vector_store %arg12[%c0_71, %c0_72], %194 {strides = array<i32>} : memref<16x32xbf16, #tpu.memory_space<vmem>>, vector<16x32xbf16>,
    } else {
    }
    %c0 = arith.constant 0 : index
    %c0_1 = arith.constant 0 : index
    %c0_2 = arith.constant 0 : index
    %3 = vector.load %arg2[%c0, %c0_1, %c0_2] : memref<2x8x32xf32, #tpu.memory_space<vmem>>, vector<2x8x32xf32>
    %4 = vector.shape_cast %3 : vector<2x8x32xf32> to vector<16x32xf32>
    %5 = arith.truncf %4 : vector<16x32xf32> to vector<16x32xbf16>
    %c0_3 = arith.constant 0 : index
    %c0_4 = arith.constant 0 : index
    %6 = vector.load %arg4[%c0_3, %c0_4] : memref<32x32xbf16, #tpu.memory_space<vmem>>, vector<32x32xbf16>
    %cst = arith.constant dense<0.000000e+00> : vector<16x32xf32>
    %7 = tpu.matmul %5, %6, %cst {dimension_numbers = #tpu.dot_dimension_numbers<[1], [0], [0], [1], [0, 0, 1, 1], [], []>} : vector<16x32xbf16>, vector<32x32xbf16>, vector<16x32xf32> -> vector<16x32xf32>
    %c0_5 = arith.constant 0 : index
    %c0_6 = arith.constant 0 : index
    %8 = vector.load %arg7[%c0_5, %c0_6] : memref<1x32xf32, #tpu.memory_space<vmem>>, vector<1x32xf32>
    %9 = vector.broadcast %8 : vector<1x32xf32> to vector<16x32xf32>
    %10 = arith.addf %7, %9 : vector<16x32xf32>
    %11 = arith.truncf %10 : vector<16x32xf32> to vector<16x32xbf16>
    %c0_7 = arith.constant 0 : index
    %c0_8 = arith.constant 0 : index
    %c0_9 = arith.constant 0 : index
    %12 = vector.load %arg3[%c0_7, %c0_8, %c0_9] : memref<2x1x8xf32, #tpu.memory_space<vmem>>, vector<2x1x8xf32>
    %cst_10 = arith.constant 1.000000e+00 : f32
    %13 = vector.broadcast %cst_10 : f32 to vector<2x1x8xf32>
    %14 = arith.subf %13, %12 : vector<2x1x8xf32>
    %cst_11 = arith.constant -1.000000e+04 : f32
    %15 = vector.broadcast %cst_11 : f32 to vector<2x1x8xf32>
    %16 = arith.mulf %14, %15 : vector<2x1x8xf32>
    %17 = vector.extract_strided_slice %11 {offsets = [0, 0], sizes = [8, 32], strides = [1, 1]} : vector<16x32xbf16> to vector<8x32xbf16>
    %c0_12 = arith.constant 0 : index
    %c0_13 = arith.constant 0 : index
    %18 = vector.load %arg11[%c0_12, %c0_13] : memref<16x32xbf16, #tpu.memory_space<vmem>>, vector<8x32xbf16>
    %c0_14 = arith.constant 0 : index
    %c0_15 = arith.constant 0 : index
    %19 = vector.load %arg12[%c0_14, %c0_15] : memref<16x32xbf16, #tpu.memory_space<vmem>>, vector<8x32xbf16>
    %20 = vector.extract_strided_slice %16 {offsets = [0, 0, 0], sizes = [1, 1, 8], strides = [1, 1, 1]} : vector<2x1x8xf32> to vector<1x1x8xf32>
    %21 = vector.shape_cast %20 : vector<1x1x8xf32> to vector<1x8xf32>
    %22 = vector.extract_strided_slice %17 {offsets = [0, 0], sizes = [8, 8], strides = [1, 1]} : vector<8x32xbf16> to vector<8x8xbf16>
    %23 = vector.extract_strided_slice %18 {offsets = [0, 0], sizes = [8, 8], strides = [1, 1]} : vector<8x32xbf16> to vector<8x8xbf16>
    %24 = vector.extract_strided_slice %19 {offsets = [0, 0], sizes = [8, 8], strides = [1, 1]} : vector<8x32xbf16> to vector<8x8xbf16>
    %cst_16 = arith.constant dense<0.000000e+00> : vector<8x8xf32>
    %25 = tpu.matmul %22, %23, %cst_16 {dimension_numbers = #tpu.dot_dimension_numbers<[1], [1], [0], [0], [0, 0, 1, 0], [], []>} : vector<8x8xbf16>, vector<8x8xbf16>, vector<8x8xf32> -> vector<8x8xf32>
    %26 = vector.broadcast %21 : vector<1x8xf32> to vector<8x8xf32>
    %27 = arith.addf %25, %26 : vector<8x8xf32>
    %cst_17 = arith.constant dense<0xFF800000> : vector<8xf32>
    %28 = vector.multi_reduction <maximumf>, %27, %cst_17 [1] : vector<8x8xf32> to vector<8xf32>
    %29 = vector.shape_cast %28 : vector<8xf32> to vector<8x1xf32>
    %30 = vector.broadcast %29 : vector<8x1xf32> to vector<8x8xf32>
    %31 = arith.subf %27, %30 : vector<8x8xf32>
    %32 = math.exp %31 : vector<8x8xf32>
    %cst_18 = arith.constant dense<0.000000e+00> : vector<8xf32>
    %33 = vector.multi_reduction <add>, %32, %cst_18 [1] : vector<8x8xf32> to vector<8xf32>
    %34 = vector.shape_cast %33 : vector<8xf32> to vector<8x1xf32>
    %35 = tpu.reciprocal %34 {approx = true} : vector<8x1xf32> -> vector<8x1xf32>
    %36 = vector.broadcast %35 : vector<8x1xf32> to vector<8x8xf32>
    %37 = arith.mulf %32, %36 : vector<8x8xf32>
    %38 = arith.truncf %37 : vector<8x8xf32> to vector<8x8xbf16>
    %cst_19 = arith.constant dense<0.000000e+00> : vector<8x8xf32>
    %39 = tpu.matmul %38, %24, %cst_19 {dimension_numbers = #tpu.dot_dimension_numbers<[1], [0], [0], [1], [0, 0, 1, 1], [], []>} : vector<8x8xbf16>, vector<8x8xbf16>, vector<8x8xf32> -> vector<8x8xf32>
    %40 = vector.extract_strided_slice %17 {offsets = [0, 8], sizes = [8, 8], strides = [1, 1]} : vector<8x32xbf16> to vector<8x8xbf16>
    %41 = vector.extract_strided_slice %18 {offsets = [0, 8], sizes = [8, 8], strides = [1, 1]} : vector<8x32xbf16> to vector<8x8xbf16>
    %42 = vector.extract_strided_slice %19 {offsets = [0, 8], sizes = [8, 8], strides = [1, 1]} : vector<8x32xbf16> to vector<8x8xbf16>
    %cst_20 = arith.constant dense<0.000000e+00> : vector<8x8xf32>
    %43 = tpu.matmul %40, %41, %cst_20 {dimension_numbers = #tpu.dot_dimension_numbers<[1], [1], [0], [0], [0, 0, 1, 0], [], []>} : vector<8x8xbf16>, vector<8x8xbf16>, vector<8x8xf32> -> vector<8x8xf32>
    %44 = vector.broadcast %21 : vector<1x8xf32> to vector<8x8xf32>
    %45 = arith.addf %43, %44 : vector<8x8xf32>
    %cst_21 = arith.constant dense<0xFF800000> : vector<8xf32>
    %46 = vector.multi_reduction <maximumf>, %45, %cst_21 [1] : vector<8x8xf32> to vector<8xf32>
    %47 = vector.shape_cast %46 : vector<8xf32> to vector<8x1xf32>
    %48 = vector.broadcast %47 : vector<8x1xf32> to vector<8x8xf32>
    %49 = arith.subf %45, %48 : vector<8x8xf32>
    %50 = math.exp %49 : vector<8x8xf32>
    %cst_22 = arith.constant dense<0.000000e+00> : vector<8xf32>
    %51 = vector.multi_reduction <add>, %50, %cst_22 [1] : vector<8x8xf32> to vector<8xf32>
    %52 = vector.shape_cast %51 : vector<8xf32> to vector<8x1xf32>
    %53 = tpu.reciprocal %52 {approx = true} : vector<8x1xf32> -> vector<8x1xf32>
    %54 = vector.broadcast %53 : vector<8x1xf32> to vector<8x8xf32>
    %55 = arith.mulf %50, %54 : vector<8x8xf32>
    %56 = arith.truncf %55 : vector<8x8xf32> to vector<8x8xbf16>
    %cst_23 = arith.constant dense<0.000000e+00> : vector<8x8xf32>
    %57 = tpu.matmul %56, %42, %cst_23 {dimension_numbers = #tpu.dot_dimension_numbers<[1], [0], [0], [1], [0, 0, 1, 1], [], []>} : vector<8x8xbf16>, vector<8x8xbf16>, vector<8x8xf32> -> vector<8x8xf32>
    %58 = vector.extract_strided_slice %17 {offsets = [0, 16], sizes = [8, 8], strides = [1, 1]} : vector<8x32xbf16> to vector<8x8xbf16>
    %59 = vector.extract_strided_slice %18 {offsets = [0, 16], sizes = [8, 8], strides = [1, 1]} : vector<8x32xbf16> to vector<8x8xbf16>
    %60 = vector.extract_strided_slice %19 {offsets = [0, 16], sizes = [8, 8], strides = [1, 1]} : vector<8x32xbf16> to vector<8x8xbf16>
    %cst_24 = arith.constant dense<0.000000e+00> : vector<8x8xf32>
    %61 = tpu.matmul %58, %59, %cst_24 {dimension_numbers = #tpu.dot_dimension_numbers<[1], [1], [0], [0], [0, 0, 1, 0], [], []>} : vector<8x8xbf16>, vector<8x8xbf16>, vector<8x8xf32> -> vector<8x8xf32>
    %62 = vector.broadcast %21 : vector<1x8xf32> to vector<8x8xf32>
    %63 = arith.addf %61, %62 : vector<8x8xf32>
    %cst_25 = arith.constant dense<0xFF800000> : vector<8xf32>
    %64 = vector.multi_reduction <maximumf>, %63, %cst_25 [1] : vector<8x8xf32> to vector<8xf32>
    %65 = vector.shape_cast %64 : vector<8xf32> to vector<8x1xf32>
    %66 = vector.broadcast %65 : vector<8x1xf32> to vector<8x8xf32>
    %67 = arith.subf %63, %66 : vector<8x8xf32>
    %68 = math.exp %67 : vector<8x8xf32>
    %cst_26 = arith.constant dense<0.000000e+00> : vector<8xf32>
    %69 = vector.multi_reduction <add>, %68, %cst_26 [1] : vector<8x8xf32> to vector<8xf32>
    %70 = vector.shape_cast %69 : vector<8xf32> to vector<8x1xf32>
    %71 = tpu.reciprocal %70 {approx = true} : vector<8x1xf32> -> vector<8x1xf32>
    %72 = vector.broadcast %71 : vector<8x1xf32> to vector<8x8xf32>
    %73 = arith.mulf %68, %72 : vector<8x8xf32>
    %74 = arith.truncf %73 : vector<8x8xf32> to vector<8x8xbf16>
    %cst_27 = arith.constant dense<0.000000e+00> : vector<8x8xf32>
    %75 = tpu.matmul %74, %60, %cst_27 {dimension_numbers = #tpu.dot_dimension_numbers<[1], [0], [0], [1], [0, 0, 1, 1], [], []>} : vector<8x8xbf16>, vector<8x8xbf16>, vector<8x8xf32> -> vector<8x8xf32>
    %76 = vector.extract_strided_slice %17 {offsets = [0, 24], sizes = [8, 8], strides = [1, 1]} : vector<8x32xbf16> to vector<8x8xbf16>
    %77 = vector.extract_strided_slice %18 {offsets = [0, 24], sizes = [8, 8], strides = [1, 1]} : vector<8x32xbf16> to vector<8x8xbf16>
    %78 = vector.extract_strided_slice %19 {offsets = [0, 24], sizes = [8, 8], strides = [1, 1]} : vector<8x32xbf16> to vector<8x8xbf16>
    %cst_28 = arith.constant dense<0.000000e+00> : vector<8x8xf32>
    %79 = tpu.matmul %76, %77, %cst_28 {dimension_numbers = #tpu.dot_dimension_numbers<[1], [1], [0], [0], [0, 0, 1, 0], [], []>} : vector<8x8xbf16>, vector<8x8xbf16>, vector<8x8xf32> -> vector<8x8xf32>
    %80 = vector.broadcast %21 : vector<1x8xf32> to vector<8x8xf32>
    %81 = arith.addf %79, %80 : vector<8x8xf32>
    %cst_29 = arith.constant dense<0xFF800000> : vector<8xf32>
    %82 = vector.multi_reduction <maximumf>, %81, %cst_29 [1] : vector<8x8xf32> to vector<8xf32>
    %83 = vector.shape_cast %82 : vector<8xf32> to vector<8x1xf32>
    %84 = vector.broadcast %83 : vector<8x1xf32> to vector<8x8xf32>
    %85 = arith.subf %81, %84 : vector<8x8xf32>
    %86 = math.exp %85 : vector<8x8xf32>
    %cst_30 = arith.constant dense<0.000000e+00> : vector<8xf32>
    %87 = vector.multi_reduction <add>, %86, %cst_30 [1] : vector<8x8xf32> to vector<8xf32>
    %88 = vector.shape_cast %87 : vector<8xf32> to vector<8x1xf32>
    %89 = tpu.reciprocal %88 {approx = true} : vector<8x1xf32> -> vector<8x1xf32>
    %90 = vector.broadcast %89 : vector<8x1xf32> to vector<8x8xf32>
    %91 = arith.mulf %86, %90 : vector<8x8xf32>
    %92 = arith.truncf %91 : vector<8x8xf32> to vector<8x8xbf16>
    %cst_31 = arith.constant dense<0.000000e+00> : vector<8x8xf32>
    %93 = tpu.matmul %92, %78, %cst_31 {dimension_numbers = #tpu.dot_dimension_numbers<[1], [0], [0], [1], [0, 0, 1, 1], [], []>} : vector<8x8xbf16>, vector<8x8xbf16>, vector<8x8xf32> -> vector<8x8xf32>
    %94 = tpu.concatenate %39, %57, %75, %93 in 1 : vector<8x8xf32>, vector<8x8xf32>, vector<8x8xf32>, vector<8x8xf32> -> vector<8x32xf32>
    %c0_32 = arith.constant 0 : index
    %c0_33 = arith.constant 0 : index
    %c0_34 = arith.constant 0 : index
    %95 = vector.load %arg10[%c0_32, %c0_33, %c0_34] : memref<2x8x32xf32, #tpu.memory_space<vmem>>, vector<1x8x32xf32>
    %96 = vector.shape_cast %95 : vector<1x8x32xf32> to vector<8x32xf32>
    %97 = vector.shape_cast %94 : vector<8x32xf32> to vector<1x8x32xf32>
    tpu.vector_store %arg10[%c0_32, %c0_33, %c0_34], %97 {strides = array<i32>} : memref<2x8x32xf32, #tpu.memory_space<vmem>>, vector<1x8x32xf32>,
    %98 = vector.extract_strided_slice %11 {offsets = [8, 0], sizes = [8, 32], strides = [1, 1]} : vector<16x32xbf16> to vector<8x32xbf16>
    %c8 = arith.constant 8 : index
    %c0_35 = arith.constant 0 : index
    %99 = vector.load %arg11[%c8, %c0_35] : memref<16x32xbf16, #tpu.memory_space<vmem>>, vector<8x32xbf16>
    %c8_36 = arith.constant 8 : index
    %c0_37 = arith.constant 0 : index
    %100 = vector.load %arg12[%c8_36, %c0_37] : memref<16x32xbf16, #tpu.memory_space<vmem>>, vector<8x32xbf16>
    %101 = vector.extract_strided_slice %16 {offsets = [1, 0, 0], sizes = [1, 1, 8], strides = [1, 1, 1]} : vector<2x1x8xf32> to vector<1x1x8xf32>
    %102 = vector.shape_cast %101 : vector<1x1x8xf32> to vector<1x8xf32>
    %103 = vector.extract_strided_slice %98 {offsets = [0, 0], sizes = [8, 8], strides = [1, 1]} : vector<8x32xbf16> to vector<8x8xbf16>
    %104 = vector.extract_strided_slice %99 {offsets = [0, 0], sizes = [8, 8], strides = [1, 1]} : vector<8x32xbf16> to vector<8x8xbf16>
    %105 = vector.extract_strided_slice %100 {offsets = [0, 0], sizes = [8, 8], strides = [1, 1]} : vector<8x32xbf16> to vector<8x8xbf16>
    %cst_38 = arith.constant dense<0.000000e+00> : vector<8x8xf32>
    %106 = tpu.matmul %103, %104, %cst_38 {dimension_numbers = #tpu.dot_dimension_numbers<[1], [1], [0], [0], [0, 0, 1, 0], [], []>} : vector<8x8xbf16>, vector<8x8xbf16>, vector<8x8xf32> -> vector<8x8xf32>
    %107 = vector.broadcast %102 : vector<1x8xf32> to vector<8x8xf32>
    %108 = arith.addf %106, %107 : vector<8x8xf32>
    %cst_39 = arith.constant dense<0xFF800000> : vector<8xf32>
    %109 = vector.multi_reduction <maximumf>, %108, %cst_39 [1] : vector<8x8xf32> to vector<8xf32>
    %110 = vector.shape_cast %109 : vector<8xf32> to vector<8x1xf32>
    %111 = vector.broadcast %110 : vector<8x1xf32> to vector<8x8xf32>
    %112 = arith.subf %108, %111 : vector<8x8xf32>
    %113 = math.exp %112 : vector<8x8xf32>
    %cst_40 = arith.constant dense<0.000000e+00> : vector<8xf32>
    %114 = vector.multi_reduction <add>, %113, %cst_40 [1] : vector<8x8xf32> to vector<8xf32>
    %115 = vector.shape_cast %114 : vector<8xf32> to vector<8x1xf32>
    %116 = tpu.reciprocal %115 {approx = true} : vector<8x1xf32> -> vector<8x1xf32>
    %117 = vector.broadcast %116 : vector<8x1xf32> to vector<8x8xf32>
    %118 = arith.mulf %113, %117 : vector<8x8xf32>
    %119 = arith.truncf %118 : vector<8x8xf32> to vector<8x8xbf16>
    %cst_41 = arith.constant dense<0.000000e+00> : vector<8x8xf32>
    %120 = tpu.matmul %119, %105, %cst_41 {dimension_numbers = #tpu.dot_dimension_numbers<[1], [0], [0], [1], [0, 0, 1, 1], [], []>} : vector<8x8xbf16>, vector<8x8xbf16>, vector<8x8xf32> -> vector<8x8xf32>
    %121 = vector.extract_strided_slice %98 {offsets = [0, 8], sizes = [8, 8], strides = [1, 1]} : vector<8x32xbf16> to vector<8x8xbf16>
    %122 = vector.extract_strided_slice %99 {offsets = [0, 8], sizes = [8, 8], strides = [1, 1]} : vector<8x32xbf16> to vector<8x8xbf16>
    %123 = vector.extract_strided_slice %100 {offsets = [0, 8], sizes = [8, 8], strides = [1, 1]} : vector<8x32xbf16> to vector<8x8xbf16>
    %cst_42 = arith.constant dense<0.000000e+00> : vector<8x8xf32>
    %124 = tpu.matmul %121, %122, %cst_42 {dimension_numbers = #tpu.dot_dimension_numbers<[1], [1], [0], [0], [0, 0, 1, 0], [], []>} : vector<8x8xbf16>, vector<8x8xbf16>, vector<8x8xf32> -> vector<8x8xf32>
    %125 = vector.broadcast %102 : vector<1x8xf32> to vector<8x8xf32>
    %126 = arith.addf %124, %125 : vector<8x8xf32>
    %cst_43 = arith.constant dense<0xFF800000> : vector<8xf32>
    %127 = vector.multi_reduction <maximumf>, %126, %cst_43 [1] : vector<8x8xf32> to vector<8xf32>
    %128 = vector.shape_cast %127 : vector<8xf32> to vector<8x1xf32>
    %129 = vector.broadcast %128 : vector<8x1xf32> to vector<8x8xf32>
    %130 = arith.subf %126, %129 : vector<8x8xf32>
    %131 = math.exp %130 : vector<8x8xf32>
    %cst_44 = arith.constant dense<0.000000e+00> : vector<8xf32>
    %132 = vector.multi_reduction <add>, %131, %cst_44 [1] : vector<8x8xf32> to vector<8xf32>
    %133 = vector.shape_cast %132 : vector<8xf32> to vector<8x1xf32>
    %134 = tpu.reciprocal %133 {approx = true} : vector<8x1xf32> -> vector<8x1xf32>
    %135 = vector.broadcast %134 : vector<8x1xf32> to vector<8x8xf32>
    %136 = arith.mulf %131, %135 : vector<8x8xf32>
    %137 = arith.truncf %136 : vector<8x8xf32> to vector<8x8xbf16>
    %cst_45 = arith.constant dense<0.000000e+00> : vector<8x8xf32>
    %138 = tpu.matmul %137, %123, %cst_45 {dimension_numbers = #tpu.dot_dimension_numbers<[1], [0], [0], [1], [0, 0, 1, 1], [], []>} : vector<8x8xbf16>, vector<8x8xbf16>, vector<8x8xf32> -> vector<8x8xf32>
    %139 = vector.extract_strided_slice %98 {offsets = [0, 16], sizes = [8, 8], strides = [1, 1]} : vector<8x32xbf16> to vector<8x8xbf16>
    %140 = vector.extract_strided_slice %99 {offsets = [0, 16], sizes = [8, 8], strides = [1, 1]} : vector<8x32xbf16> to vector<8x8xbf16>
    %141 = vector.extract_strided_slice %100 {offsets = [0, 16], sizes = [8, 8], strides = [1, 1]} : vector<8x32xbf16> to vector<8x8xbf16>
    %cst_46 = arith.constant dense<0.000000e+00> : vector<8x8xf32>
    %142 = tpu.matmul %139, %140, %cst_46 {dimension_numbers = #tpu.dot_dimension_numbers<[1], [1], [0], [0], [0, 0, 1, 0], [], []>} : vector<8x8xbf16>, vector<8x8xbf16>, vector<8x8xf32> -> vector<8x8xf32>
    %143 = vector.broadcast %102 : vector<1x8xf32> to vector<8x8xf32>
    %144 = arith.addf %142, %143 : vector<8x8xf32>
    %cst_47 = arith.constant dense<0xFF800000> : vector<8xf32>
    %145 = vector.multi_reduction <maximumf>, %144, %cst_47 [1] : vector<8x8xf32> to vector<8xf32>
    %146 = vector.shape_cast %145 : vector<8xf32> to vector<8x1xf32>
    %147 = vector.broadcast %146 : vector<8x1xf32> to vector<8x8xf32>
    %148 = arith.subf %144, %147 : vector<8x8xf32>
    %149 = math.exp %148 : vector<8x8xf32>
    %cst_48 = arith.constant dense<0.000000e+00> : vector<8xf32>
    %150 = vector.multi_reduction <add>, %149, %cst_48 [1] : vector<8x8xf32> to vector<8xf32>
    %151 = vector.shape_cast %150 : vector<8xf32> to vector<8x1xf32>
    %152 = tpu.reciprocal %151 {approx = true} : vector<8x1xf32> -> vector<8x1xf32>
    %153 = vector.broadcast %152 : vector<8x1xf32> to vector<8x8xf32>
    %154 = arith.mulf %149, %153 : vector<8x8xf32>
    %155 = arith.truncf %154 : vector<8x8xf32> to vector<8x8xbf16>
    %cst_49 = arith.constant dense<0.000000e+00> : vector<8x8xf32>
    %156 = tpu.matmul %155, %141, %cst_49 {dimension_numbers = #tpu.dot_dimension_numbers<[1], [0], [0], [1], [0, 0, 1, 1], [], []>} : vector<8x8xbf16>, vector<8x8xbf16>, vector<8x8xf32> -> vector<8x8xf32>
    %157 = vector.extract_strided_slice %98 {offsets = [0, 24], sizes = [8, 8], strides = [1, 1]} : vector<8x32xbf16> to vector<8x8xbf16>
    %158 = vector.extract_strided_slice %99 {offsets = [0, 24], sizes = [8, 8], strides = [1, 1]} : vector<8x32xbf16> to vector<8x8xbf16>
    %159 = vector.extract_strided_slice %100 {offsets = [0, 24], sizes = [8, 8], strides = [1, 1]} : vector<8x32xbf16> to vector<8x8xbf16>
    %cst_50 = arith.constant dense<0.000000e+00> : vector<8x8xf32>
    %160 = tpu.matmul %157, %158, %cst_50 {dimension_numbers = #tpu.dot_dimension_numbers<[1], [1], [0], [0], [0, 0, 1, 0], [], []>} : vector<8x8xbf16>, vector<8x8xbf16>, vector<8x8xf32> -> vector<8x8xf32>
    %161 = vector.broadcast %102 : vector<1x8xf32> to vector<8x8xf32>
    %162 = arith.addf %160, %161 : vector<8x8xf32>
    %cst_51 = arith.constant dense<0xFF800000> : vector<8xf32>
    %163 = vector.multi_reduction <maximumf>, %162, %cst_51 [1] : vector<8x8xf32> to vector<8xf32>
    %164 = vector.shape_cast %163 : vector<8xf32> to vector<8x1xf32>
    %165 = vector.broadcast %164 : vector<8x1xf32> to vector<8x8xf32>
    %166 = arith.subf %162, %165 : vector<8x8xf32>
    %167 = math.exp %166 : vector<8x8xf32>
    %cst_52 = arith.constant dense<0.000000e+00> : vector<8xf32>
    %168 = vector.multi_reduction <add>, %167, %cst_52 [1] : vector<8x8xf32> to vector<8xf32>
    %169 = vector.shape_cast %168 : vector<8xf32> to vector<8x1xf32>
    %170 = tpu.reciprocal %169 {approx = true} : vector<8x1xf32> -> vector<8x1xf32>
    %171 = vector.broadcast %170 : vector<8x1xf32> to vector<8x8xf32>
    %172 = arith.mulf %167, %171 : vector<8x8xf32>
    %173 = arith.truncf %172 : vector<8x8xf32> to vector<8x8xbf16>
    %cst_53 = arith.constant dense<0.000000e+00> : vector<8x8xf32>
    %174 = tpu.matmul %173, %159, %cst_53 {dimension_numbers = #tpu.dot_dimension_numbers<[1], [0], [0], [1], [0, 0, 1, 1], [], []>} : vector<8x8xbf16>, vector<8x8xbf16>, vector<8x8xf32> -> vector<8x8xf32>
    %175 = tpu.concatenate %120, %138, %156, %174 in 1 : vector<8x8xf32>, vector<8x8xf32>, vector<8x8xf32>, vector<8x8xf32> -> vector<8x32xf32>
    %c1 = arith.constant 1 : index
    %c0_54 = arith.constant 0 : index
    %c0_55 = arith.constant 0 : index
    %176 = vector.load %arg10[%c1, %c0_54, %c0_55] : memref<2x8x32xf32, #tpu.memory_space<vmem>>, vector<1x8x32xf32>
    %177 = vector.shape_cast %176 : vector<1x8x32xf32> to vector<8x32xf32>
    %178 = vector.shape_cast %175 : vector<8x32xf32> to vector<1x8x32xf32>
    tpu.vector_store %arg10[%c1, %c0_54, %c0_55], %178 {strides = array<i32>} : memref<2x8x32xf32, #tpu.memory_space<vmem>>, vector<1x8x32xf32>,
    return
  }
  func.func @transform_0(%arg0: i32, %arg1: i32) -> (i32, i32, i32) {
    %c0_i32 = arith.constant 0 : i32
    %c0_i32_0 = arith.constant 0 : i32
    %c0_i32_1 = arith.constant 0 : i32
    return %arg0, %c0_i32, %c0_i32_0 : i32, i32, i32
  }
  func.func @transform_1(%arg0: i32, %arg1: i32) -> (i32, i32, i32) {
    %c0_i32 = arith.constant 0 : i32
    %c0_i32_0 = arith.constant 0 : i32
    %c0_i32_1 = arith.constant 0 : i32
    return %arg0, %c0_i32, %c0_i32_0 : i32, i32, i32
  }
  func.func @transform_2(%arg0: i32, %arg1: i32) -> (i32, i32) {
    %c0_i32 = arith.constant 0 : i32
    %c0_i32_0 = arith.constant 0 : i32
    %c0_i32_1 = arith.constant 0 : i32
    return %c0_i32, %c0_i32_0 : i32, i32
  }
  func.func @transform_3(%arg0: i32, %arg1: i32) -> (i32, i32) {
    %c0_i32 = arith.constant 0 : i32
    %c0_i32_0 = arith.constant 0 : i32
    %c0_i32_1 = arith.constant 0 : i32
    return %c0_i32, %c0_i32_0 : i32, i32
  }
  func.func @transform_4(%arg0: i32, %arg1: i32) -> (i32, i32) {
    %c0_i32 = arith.constant 0 : i32
    %c0_i32_0 = arith.constant 0 : i32
    %c0_i32_1 = arith.constant 0 : i32
    return %c0_i32, %c0_i32_0 : i32, i32
  }
  func.func @transform_5(%arg0: i32, %arg1: i32) -> (i32, i32) {
    %c0_i32 = arith.constant 0 : i32
    %c0_i32_0 = arith.constant 0 : i32
    %c0_i32_1 = arith.constant 0 : i32
    return %c0_i32, %c0_i32_0 : i32, i32
  }
  func.func @transform_6(%arg0: i32, %arg1: i32) -> (i32, i32) {
    %c0_i32 = arith.constant 0 : i32
    %c0_i32_0 = arith.constant 0 : i32
    %c0_i32_1 = arith.constant 0 : i32
    return %c0_i32, %c0_i32_0 : i32, i32
  }
  func.func @transform_7(%arg0: i32, %arg1: i32) -> (i32, i32) {
    %c0_i32 = arith.constant 0 : i32
    %c0_i32_0 = arith.constant 0 : i32
    %c0_i32_1 = arith.constant 0 : i32
    return %c0_i32, %c0_i32_0 : i32, i32
  }
  func.func @transform_8(%arg0: i32, %arg1: i32) -> (i32, i32, i32) {
    %c0_i32 = arith.constant 0 : i32
    %c0_i32_0 = arith.constant 0 : i32
    return %arg0, %arg1, %c0_i32 : i32, i32, i32
  }
}

</mosaic_0001>

<bundles_post_ra>
// kernel: tpu_custom_call.1
= control target key start
LH: loop header
LB: loop body
LE: loop exit
PB: predicated region body
PF: predicated region fallthrough
CT: control target
= control target key end

     0   :  { %13 = vsyncpa [#allocation5], 0  ;;  %s1211_s0 = inlined_call_operand.hbm [shape: f32[2,8,32], index: 0, kind: input, shape index: {}]   ;;  %s1212_s1 = inlined_call_operand.hbm [shape: f32[2,1,8], index: 1, kind: input, shape index: {}]   ;;  %s1213_s2 = inlined_call_operand.hbm [shape: bf16[32,32], index: 2, kind: input, shape index: {}]   ;;  %s1214_s3 = inlined_call_operand.hbm [shape: bf16[32,32], index: 3, kind: input, shape index: {}]   ;;  %s1215_s4 = inlined_call_operand.hbm [shape: bf16[32,32], index: 4, kind: input, shape index: {}]   ;;  %s1216_s5 = inlined_call_operand.vmem [shape: f32[1,32], index: 5, kind: input, shape index: {}]   ;;  %s1217_s6 = inlined_call_operand.vmem [shape: f32[1,32], index: 6, kind: input, shape index: {}]   ;;  %s1218_s7 = inlined_call_operand.vmem [shape: f32[1,32], index: 7, kind: input, shape index: {}]   ;;  %s1219_s8 = inlined_call_operand.hbm [shape: f32[2,8,32], index: 8, kind: output, shape index: {}]  }
   0x1   :  { %14 = vsyncpa [#allocation8], 0 }
   0x2   :  { %15 = vsyncpa [#allocation11], 0  ;;  %s34_s29 = sshll.u32 %s1212_s1, 4  ;;  %s35_s29 = int_to_ptr.hbm [resolvable:$true] %s34_s29 }
   0x3   :  { %16 = vsyncpa [#allocation6], 0  ;;  %s1020_s30 = smov [#allocation7]   ;;  %s1021_s10 = smov 16  }
   0x4   :  { %s36_s9 = sshll.u32 %s1020_s30, 4  ;;  %s1022_s11 = smov 1   ;;  %s37_s9 = int_to_ptr.vmem [resolvable:$true] %s36_s9 }
   0x5   :  { %42 = dma.hbm_to_vmem [thread:$0]  %s35_s29, 32, %s37_s9, [#allocation8], %s1021_s10, %s1021_s10, %s1022_s11  }
   0x6   :  { %s60_s14 = sshll.u32 %s1214_s3, 4  ;;  %s1023_s15 = smov [#allocation10]   ;;  %s61_s14 = int_to_ptr.hbm [resolvable:$true] %s60_s14 }
   0x7   :  { %s62_s16 = sshll.u32 %s1023_s15, 4  ;;  %s21_s1 = sshll.u32 %s1211_s0, 4  ;;  %s63_s16 = int_to_ptr.vmem [resolvable:$true] %s62_s16  ;;  %s22_s1 = int_to_ptr.hbm [resolvable:$true] %s21_s1 }
   0x8   :  { %s1024_s19 = smov 64   ;;  %s1025_s20 = smov 4  }
   0x9   :  { %68 = dma.hbm_to_vmem [thread:$0]  %s61_s14, 256, %s63_s16, [#allocation11], %s1024_s19, %s1024_s19, %s1025_s20  }
   0xa   :  { %s1026_s21 = smov [#allocation4]   ;;  %s47_s25 = sshll.u32 %s1213_s2, 4  ;;  %s48_s25 = int_to_ptr.hbm [resolvable:$true] %s47_s25 }
   0xb   :  { %s23_s22 = sshll.u32 %s1026_s21, 4  ;;  %s1027_s3 = smov 128   ;;  %s24_s22 = int_to_ptr.vmem [resolvable:$true] %s23_s22 }
   0xc   :  { %s1028_s26 = smov 8   ;;  %s1029_s0 = smov [#allocation9]  }
   0xd   :  { %29 = dma.hbm_to_vmem [thread:$0]  %s22_s1, 256, %s24_s22, [#allocation5], %s1027_s3, %s1027_s3, %s1028_s26  }
   0xe   :  { %s49_s27 = sshll.u32 %s1029_s0, 4  ;;  %s73_s30 = sshll.u32 %s1215_s4, 4  ;;  %s50_s27 = int_to_ptr.vmem [resolvable:$true] %s49_s27  ;;  %s74_s30 = int_to_ptr.hbm [resolvable:$true] %s73_s30 }
   0xf   :  { %55 = dma.hbm_to_vmem [thread:$0]  %s48_s25, 256, %s50_s27, [#allocation8], %s1024_s19, %s1024_s19, %s1025_s20  }
  0x10   :  { %s1030_s9 = smov [#allocation12]  }
  0x11   :  { %s75_s11 = sshll.u32 %s1030_s9, 4  ;;  %s76_s11 = int_to_ptr.vmem [resolvable:$true] %s75_s11 }
  0x12   :  { %81 = dma.hbm_to_vmem [thread:$0]  %s74_s30, 256, %s76_s11, [#allocation11], %s1024_s19, %s1024_s19, %s1025_s20  }
  0x13   :  { %1012 = dma.done.wait [#allocation5], 256  }
  0x14   :  { %1013 = vsyncadd [#allocation5], 4294967040 }
  0x15   :  { %1014 = dma.done.wait [#allocation8], 288  }
  0x16   :  { %1015 = vsyncadd [#allocation8], 4294967008 }
  0x17   :  { %1016 = dma.done.wait [#allocation11], 512  }
  0x18   :  { %1017 = vsyncadd [#allocation11], 4294966784  ;;  %v812_v0 = vld [vmem:[#allocation10 + $0x8] sm:$0xff]  ;;  %v816_v1 = vld [vmem:[#allocation9 + $0x8] sm:$0xff]  ;;  %vm136_vm0 = vcmask 261120   ;;  %vm190_vm1 = vcmask 257024  }
  0x19   :  { %v811_v2 = vld [vmem:[#allocation10] sm:$0xff]  ;;  %v815_v3 = vld [vmem:[#allocation9] sm:$0xff]  ;;  %146 = vmatpush.bf16.msra.mxu0 %v812_v0  ;;  %230 = vmatpush.bf16.msra.mxu2 %v816_v1  ;;  %v833_v7 = vld [vmem:[%s1217_s6] ss:$0 sm:$0xff]  ;;  %vm251_vm2 = vcmask 64512   ;;  %s1032_s6 = smov 120  }
  0x1a   :  { %v113_v4 = vld [vmem:[#allocation4] sm:$0xff]  ;;  %v114_v5 = vld [vmem:[#allocation4 + $0x8] sm:$0xff]  ;;  %v834_v11 = vld [vmem:[%s1216_s5] ss:$0 sm:$0xff]  ;;  %s1031_s5 = smov 112   ;;  %s1033_s14 = smov 104  }
  0x1b   :  { %v115_v6 = vpack.c.bf16 %v114_v5, %v113_v4  ;;  %v814_v32 = vld [vmem:[#allocation12 + $0x8] sm:$0xff]  ;;  %v813_v33 = vld [vmem:[#allocation12] sm:$0xff]  ;;  %v240_v42 = vld [vmem:[#allocation7] sm:$0x1]  ;;  %vm286_vm3 = vcmask 1043456   ;;  %vm493_vm4 = vcmask 130048  }
  0x1c   :  { %180 = vmatpush.bf16.msra.mxu1 %v814_v32  ;;  %v242_v47 = vsub.f32 1.0, %v240_v42  ;;  %v835_v61 = vld [vmem:[%s1218_s7] ss:$0 sm:$0xff]  ;;  %s1034_s7 = smov 24   ;;  %vm495_vm5 = vcmask 195584   ;;  %s753_s19 = sshll.u32 %s1219_s8, 4  ;;  %s754_s19 = int_to_ptr.hbm [resolvable:$true] %s753_s19 }
  0x1d   :  { %147 = vmatpush.bf16.msra.mxu0 %v811_v2  ;;  %231 = vmatpush.bf16.msra.mxu2 %v815_v3 }
  0x1e   :  { %v244_v48 = vmul.f32 -10000.0, %v242_v47 }
  0x20   :  { %776 = vmatmul.msk.bf16.vlgmr.msra.gmra.mxu0 %vm136_vm0, %v115_v6  ;;  %794 = vmatmul.msk.bf16.vlgmr.msra.gmra.mxu2 %vm136_vm0, %v115_v6  ;;  %v249_v51 = vperm.slane %v244_v48, 0 }
  0x21   :  { %181 = vmatpush.bf16.msra.mxu1 %v813_v33 }
  0x24   :  { %785 = vmatmul.msk.bf16.vlgmr.msra.gmra.mxu1 %vm136_vm0, %v115_v6 }
  0x9d   :  { %v149_v8 = vpop.f32.mrf.mxu0 }
  0x9e   :  { %v150_v9 = vadd.f32 %v833_v7, %v149_v8 }
  0xa0   :  { %v188_v10 = vpack.c.bf16 %v150_v9, %v150_v9 }
  0xa1   :  { %v183_v62 = vpop.f32.mrf.mxu1 }
  0xa2   :  { %191 = vst.msk [vmem:[#allocation2] sm:$0xf] %vm190_vm1, %v188_v10  ;;  %v184_v63 = vadd.f32 %v835_v61, %v183_v62 }
  0xa3   :  { %v233_v12 = vpop.f32.mrf.mxu2 }
  0xa4   :  { %v234_v13 = vadd.f32 %v834_v11, %v233_v12  ;;  %v193_v0 = vpack.c.bf16 %v184_v63, %v184_v63 }
  0xa5   :  { %v151_v14 = vpop.f32.mrf.mxu0 }
  0xa6   :  { %v238_v15 = vpack.c.bf16 %v234_v13, %v234_v13  ;;  %v152_v16 = vadd.f32 %v833_v7, %v151_v14  ;;  %195 = vst.msk [vmem:[#allocation3] sm:$0xf] %vm190_vm1, %v193_v0  ;;  %v241_v14 = vld [vmem:[#allocation7 + $0x1] sm:$0x1] }
  0xa8   :  { %v304_v17 = vunpack.c.l.b16 %v238_v15  ;;  %v189_v18 = vpack.c.bf16 %v152_v16, %v152_v16 }
  0xa9   :  { %v246_v19 = vld [vmem:[#allocation2] sm:$0xf]  ;;  %v185_v1 = vpop.f32.mrf.mxu1 }
  0xaa   :  { %v305_v20 = vpack.c.b16 %v304_v17, %v304_v17  ;;  %192 = vst.msk [vmem:[#allocation2 + $0x4] sm:$0xf] %vm190_vm1, %v189_v18  ;;  %v256_v21 = vsel %vm251_vm2, %v246_v19, 0  ;;  %v309_v22 = vunpack.c.l.b16 %v246_v19  ;;  %v186_v2 = vadd.f32 %v835_v61, %v185_v1 }
  0xab   :  { %265 = vmatpush.bf16.xpose.msra.mxu3 %v256_v21  ;;  %v235_v24 = vpop.f32.mrf.mxu2  ;;  %v243_v17 = vsub.f32 1.0, %v241_v14 }
  0xac   :  { %v310_v23 = vpack.c.b16 %v309_v22, %v309_v22  ;;  %368 = vrot.lane.b32.xlu2 %v305_v20, %s1031_s5  ;;  %v236_v25 = vadd.f32 %v834_v11, %v235_v24  ;;  %v194_v3 = vpack.c.bf16 %v186_v2, %v186_v2 }
  0xad   :  { %v247_v4 = vld [vmem:[#allocation3] sm:$0xf]  ;;  %v245_v19 = vmul.f32 -10000.0, %v243_v17 }
  0xae   :  { %370 = vrot.lane.b32.xlu1 %v310_v23, %s1031_s5  ;;  %311 = vrot.lane.b32.xlu0 %v310_v23, %s1032_s6  ;;  %v239_v27 = vpack.c.bf16 %v236_v25, %v236_v25  ;;  %196 = vst.msk [vmem:[#allocation3 + $0x4] sm:$0xf] %vm190_vm1, %v194_v3  ;;  %v288_v5 = vsel %vm286_vm3, %v247_v4, 0 }
  0xaf   :  { %297 = vmatpush.bf16.msrb.mxu0 %v288_v5 }
  0xb0   :  { %v554_v29 = vunpack.c.l.b16 %v239_v27 }
  0xb1   :  { %v498_v26 = vld [vmem:[#allocation2 + $0x4] sm:$0xf] }
  0xb2   :  { %795 = vmatmul.msk.bf16.vlgmr.msra.gmra.mxu3 %vm251_vm2, %v238_v15  ;;  %v559_v28 = vunpack.c.l.b16 %v498_v26  ;;  %v555_v31 = vpack.c.b16 %v554_v29, %v554_v29  ;;  %v507_v40 = vsel %vm251_vm2, %v498_v26, 0 }
  0xb4   :  { %424 = vrot.lane.b32.xlu2 %v305_v20, %s1033_s14  ;;  %v560_v30 = vpack.c.b16 %v559_v28, %v559_v28 }
  0xb5   :  { %v499_v1 = vld [vmem:[#allocation3 + $0x4] sm:$0xf] }
  0xb6   :  { %426 = vrot.lane.b32.xlu1 %v310_v23, %s1033_s14  ;;  %306 = vrot.lane.b32.xlu0 %v305_v20, %s1032_s6  ;;  %v501_v23 = vperm.slane %v245_v19, 0 }
  0xbc   :  { %620 = vrot.lane.b32.xlu2 %v560_v30, %s1031_s5 }
  0xbe   :  { %556 = vrot.lane.b32.xlu1 %v555_v31, %s1032_s6  ;;  %561 = vrot.lane.b32.xlu0 %v560_v30, %s1032_s6 }
  0xc4   :  { %674 = vrot.lane.b32.xlu2 %v555_v31, %s1033_s14 }
  0xc6   :  { %618 = vrot.lane.b32.xlu1 %v555_v31, %s1031_s5  ;;  %676 = vrot.lane.b32.xlu0 %v560_v30, %s1033_s14 }
 0x106   :  { %v369_v34 = vpop.permute.xlu2 %368 }
 0x10e   :  { %v425_v35 = vpop.permute.xlu2 %424 }
 0x116   :  { %v621_v41 = vpop.permute.xlu2 %620 }
 0x117   :  { %v626_v45 = vsel %vm251_vm2, %v621_v41, 0 }
 0x11e   :  { %v675_v60 = vpop.permute.xlu2 %674 }
 0x120   :  { %v371_v36 = vpop.permute.xlu1 %370  ;;  %v312_v37 = vpop.permute.xlu0 %311 }
 0x121   :  { %v317_v38 = vsel %vm251_vm2, %v312_v37, 0  ;;  %v376_v39 = vsel %vm251_vm2, %v371_v36, 0 }
 0x122   :  { %326 = vmatpush.bf16.xpose.msrb.mxu1 %v317_v38  ;;  %385 = vmatpush.bf16.xpose.msrb.mxu3 %v376_v39  ;;  %v345_v38 = vunpack.c.l.b16 %v247_v4 }
 0x124   :  { %v346_v41 = vpack.c.b16 %v345_v38, %v345_v38 }
 0x128   :  { %v427_v43 = vpop.permute.xlu1 %426  ;;  %v307_v44 = vpop.permute.xlu0 %306 }
 0x129   :  { %v432_v46 = vsel %vm251_vm2, %v427_v43, 0  ;;  %797 = vmatmul.msk.bf16.vlgmr.msrb.gmra.mxu1 %vm251_vm2, %v307_v44  ;;  %799 = vmatmul.msk.bf16.vlgmr.msrb.gmra.mxu3 %vm251_vm2, %v369_v34 }
 0x12a   :  { %516 = vmatpush.bf16.xpose.msra.mxu3 %v507_v40  ;;  %441 = vmatpush.bf16.xpose.msra.mxu1 %v432_v46 }
 0x130   :  { %v562_v49 = vpop.permute.xlu0 %561  ;;  %v557_v58 = vpop.permute.xlu1 %556 }
 0x131   :  { %v567_v50 = vsel %vm251_vm2, %v562_v49, 0 }
 0x132   :  { %635 = vmatpush.bf16.xpose.msrb.mxu3 %v626_v45  ;;  %576 = vmatpush.bf16.xpose.msrb.mxu1 %v567_v50 }
 0x135   :  { %v267_v52 = vpop.f32.mrf.mxu3 }
 0x136   :  { %v268_v53 = vadd.f32 %v267_v52, %v249_v51 }
 0x138   :  { %v677_v54 = vpop.permute.xlu0 %676  ;;  %v271_v55 = vsel %vm251_vm2, %v268_v53, -inf  ;;  %v619_v59 = vpop.permute.xlu1 %618 }
 0x139   :  { %v682_v56 = vsel %vm251_vm2, %v677_v54, 0  ;;  %801 = vmatmul.msk.bf16.vlgmr.msra.gmra.mxu1 %vm251_vm2, %v425_v35  ;;  %803 = vmatmul.msk.bf16.vlgmr.msra.gmra.mxu3 %vm251_vm2, %v239_v27 }
 0x13a   :  { %272 = vmax.xlane.f32.xlu1 %v271_v55  ;;  %691 = vmatpush.bf16.xpose.msra.mxu1 %v682_v56 }
 0x13d   :  { %v269_v57 = vpop.f32.mrf.mxu3 }
 0x149   :  { %805 = vmatmul.msk.bf16.vlgmr.msrb.gmra.mxu1 %vm251_vm2, %v557_v58  ;;  %807 = vmatmul.msk.bf16.vlgmr.msrb.gmra.mxu3 %vm251_vm2, %v619_v59 }
 0x159   :  { %809 = vmatmul.msk.bf16.vlgmr.msra.gmra.mxu1 %vm251_vm2, %v675_v60 }
 0x1a6   :  { %v328_v6 = vpop.f32.mrf.mxu1 }
 0x1a7   :  { %v329_v7 = vadd.f32 %v328_v6, %v249_v51  ;;  %v538_v6 = vsel %vm286_vm3, %v499_v1, 0 }
 0x1a9   :  { %v332_v8 = vsel %vm251_vm2, %v329_v7, -inf }
 0x1aa   :  { %333 = vmax.xlane.f32.xlu0 %v332_v8 }
 0x1ac   :  { %v387_v9 = vpop.f32.mrf.mxu3 }
 0x1ad   :  { %v388_v10 = vadd.f32 %v387_v9, %v249_v51  ;;  %v273_v11 = vpop.xlane.xlu1 %272 }
 0x1ae   :  { %v274_v12 = vsub.f32 %v268_v53, %v273_v11  ;;  %v330_v13 = vpop.f32.mrf.mxu1 }
 0x1af   :  { %v391_v15 = vsel %vm251_vm2, %v388_v10, -inf }
 0x1b0   :  { %v275_v16 = vmul.f32 1.442695, %v274_v12  ;;  %392 = vmax.xlane.f32.xlu2 %v391_v15 }
 0x1b2   :  { %836 = vpow2.f32 %v275_v16 }
 0x1b4   :  { %v389_v18 = vpop.f32.mrf.mxu3 }
 0x1b6   :  { %v443_v20 = vpop.f32.mrf.mxu1 }
 0x1b7   :  { %v444_v25 = vadd.f32 %v443_v20, %v249_v51 }
 0x1b8   :  { %v837_v21 = vpop.eup %836 }
 0x1b9   :  { %v277_v22 = vsel %vm251_vm2, %v837_v21, 0.0  ;;  %v447_v29 = vsel %vm251_vm2, %v444_v25, -inf }
 0x1ba   :  { %278 = vadd.xlane.f32.xlu2 %v277_v22 }
 0x1bc   :  { %v518_v24 = vpop.f32.mrf.mxu3 }
 0x1bd   :  { %v519_v26 = vadd.f32 %v518_v24, %v501_v23 }
 0x1be   :  { %v445_v27 = vpop.f32.mrf.mxu1 }
 0x1bf   :  { %v522_v28 = vsel %vm251_vm2, %v519_v26, -inf }
 0x1c0   :  { %523 = vmax.xlane.f32.xlu1 %v522_v28 }
 0x1c2   :  { %448 = vmax.xlane.f32.xlu2 %v447_v29 }
 0x1c4   :  { %v520_v30 = vpop.f32.mrf.mxu3 }
 0x1c6   :  { %v578_v31 = vpop.f32.mrf.mxu1 }
 0x1c7   :  { %v579_v32 = vadd.f32 %v578_v31, %v501_v23 }
 0x1c9   :  { %v582_v33 = vsel %vm251_vm2, %v579_v32, -inf }
 0x1ca   :  { %583 = vmax.xlane.f32.xlu0 %v582_v33 }
 0x1cc   :  { %v637_v34 = vpop.f32.mrf.mxu3 }
 0x1cd   :  { %v638_v35 = vadd.f32 %v637_v34, %v501_v23 }
 0x1ce   :  { %v580_v36 = vpop.f32.mrf.mxu1 }
 0x1cf   :  { %v641_v37 = vsel %vm251_vm2, %v638_v35, -inf }
 0x1d0   :  { %642 = vmax.xlane.f32.xlu1 %v641_v37 }
 0x1d4   :  { %v639_v39 = vpop.f32.mrf.mxu3 }
 0x1d6   :  { %v693_v40 = vpop.f32.mrf.mxu1 }
 0x1d7   :  { %v1157_v43 = vadd.f32 %v693_v40, %v501_v23 }
 0x1d9   :  { %v697_v44 = vsel %vm251_vm2, %v1157_v43, -inf }
 0x1da   :  { %403 = vrot.lane.b32.xlu2 %v346_v41, %s1031_s5 }
 0x1de   :  { %347 = vrot.lane.b32.xlu0 %v346_v41, %s1032_s6  ;;  %v695_v42 = vpop.f32.mrf.mxu1 }
 0x1e9   :  { %459 = vrot.lane.b32.xlu1 %v346_v41, %s1033_s14 }
 0x203   :  { %698 = vmax.xlane.f32.xlu2 %v697_v44 }
 0x21d   :  { %v334_v45 = vpop.xlane.xlu0 %333 }
 0x21e   :  { %v335_v46 = vsub.f32 %v329_v7, %v334_v45 }
 0x220   :  { %v336_v47 = vmul.f32 1.442695, %v335_v46 }
 0x222   :  { %838 = vpow2.f32 %v336_v47 }
 0x223   :  { %v393_v48 = vpop.xlane.xlu2 %392 }
 0x224   :  { %v394_v49 = vsub.f32 %v388_v10, %v393_v48  ;;  %v595_v10 = vunpack.c.l.b16 %v499_v1 }
 0x226   :  { %v395_v50 = vmul.f32 1.442695, %v394_v49  ;;  %v596_v15 = vpack.c.b16 %v595_v10, %v595_v10 }
 0x228   :  { %v1161_v51 = vpop.eup %838  ;;  %840 = vpow2.f32 %v395_v50 }
 0x229   :  { %v338_v52 = vsel %vm251_vm2, %v1161_v51, 0.0 }
 0x22a   :  { %339 = vadd.xlane.f32.xlu0 %v338_v52 }
 0x22d   :  { %v279_v53 = vpop.xlane.xlu2 %278 }
 0x22e   :  { %v1165_v54 = vpop.eup %840  ;;  %842 = vrcp.f32 %v279_v53 }
 0x22f   :  { %v397_v55 = vsel %vm251_vm2, %v1165_v54, 0.0 }
 0x230   :  { %398 = vadd.xlane.f32.xlu2 %v397_v55 }
 0x233   :  { %v524_v58 = vpop.xlane.xlu1 %523 }
 0x234   :  { %v843_v56 = vpop.eup %842  ;;  %v525_v62 = vsub.f32 %v519_v26, %v524_v58 }
 0x235   :  { %v281_v57 = vmul.f32 %v843_v56, %v837_v21  ;;  %v449_v59 = vpop.xlane.xlu2 %448 }
 0x236   :  { %v450_v60 = vsub.f32 %v444_v25, %v449_v59  ;;  %v526_v0 = vmul.f32 1.442695, %v525_v62 }
 0x237   :  { %v282_v61 = vpack.c.bf16 %v281_v57, %v281_v57 }
 0x238   :  { %v451_v63 = vmul.f32 1.442695, %v450_v60 }
 0x239   :  { %796 = vmatmul.msk.bf16.vlgmr.msrb.gmra.mxu0 %vm251_vm2, %v282_v61 }
 0x23a   :  { %844 = vpow2.f32 %v451_v63 }
 0x23b   :  { %846 = vpow2.f32 %v526_v0 }
 0x23d   :  { %v404_v2 = vpop.permute.xlu2 %403  ;;  %v584_v3 = vpop.xlane.xlu0 %583 }
 0x23e   :  { %v409_v4 = vsel %vm286_vm3, %v404_v2, 0  ;;  %v585_v5 = vsub.f32 %v579_v32, %v584_v3 }
 0x23f   :  { %418 = vmatpush.bf16.msra.mxu0 %v409_v4 }
 0x240   :  { %v845_v7 = vpop.eup %844  ;;  %v586_v8 = vmul.f32 1.442695, %v585_v5 }
 0x241   :  { %v453_v9 = vsel %vm251_vm2, %v845_v7, 0.0  ;;  %v847_v13 = vpop.eup %846 }
 0x242   :  { %848 = vpow2.f32 %v586_v8  ;;  %454 = vadd.xlane.f32.xlu1 %v453_v9  ;;  %v528_v17 = vsel %vm251_vm2, %v847_v13, 0.0 }
 0x243   :  { %547 = vmatpush.bf16.msrb.mxu0 %v538_v6  ;;  %v643_v11 = vpop.xlane.xlu1 %642 }
 0x244   :  { %v644_v12 = vsub.f32 %v638_v35, %v643_v11 }
 0x246   :  { %v645_v14 = vmul.f32 1.442695, %v644_v12 }
 0x248   :  { %v849_v16 = vpop.eup %848  ;;  %850 = vpow2.f32 %v645_v14  ;;  %597 = vrot.lane.b32.xlu2 %v596_v15, %s1032_s6 }
 0x249   :  { %v588_v18 = vsel %vm251_vm2, %v849_v16, 0.0 }
 0x24a   :  { %529 = vadd.xlane.f32.xlu1 %v528_v17  ;;  %589 = vadd.xlane.f32.xlu0 %v588_v18 }
 0x24e   :  { %v851_v19 = vpop.eup %850 }
 0x24f   :  { %v647_v22 = vsel %vm251_vm2, %v851_v19, 0.0 }
 0x250   :  { %v348_v20 = vpop.permute.xlu0 %347 }
 0x251   :  { %v353_v21 = vsel %vm286_vm3, %v348_v20, 0 }
 0x252   :  { %362 = vmatpush.bf16.msrb.mxu2 %v353_v21  ;;  %648 = vadd.xlane.f32.xlu0 %v647_v22 }
 0x25b   :  { %v460_v23 = vpop.permute.xlu1 %459 }
 0x25c   :  { %v465_v24 = vsel %vm286_vm3, %v460_v23, 0 }
 0x25d   :  { %474 = vmatpush.bf16.msra.mxu2 %v465_v24 }
 0x263   :  { %653 = vrot.lane.b32.xlu1 %v596_v15, %s1031_s5 }
 0x266   :  { %709 = vrot.lane.b32.xlu0 %v596_v15, %s1033_s14 }
 0x276   :  { %v699_v25 = vpop.xlane.xlu2 %698 }
 0x277   :  { %v700_v26 = vsub.f32 %v1157_v43, %v699_v25 }
 0x279   :  { %v701_v27 = vmul.f32 1.442695, %v700_v26 }
 0x27b   :  { %852 = vpow2.f32 %v701_v27 }
 0x281   :  { %v853_v28 = vpop.eup %852 }
 0x282   :  { %v703_v29 = vsel %vm251_vm2, %v853_v28, 0.0 }
 0x283   :  { %704 = vadd.xlane.f32.xlu2 %v703_v29 }
 0x29d   :  { %v340_v30 = vpop.xlane.xlu0 %339 }
 0x29e   :  { %854 = vrcp.f32 %v340_v30 }
 0x2a3   :  { %v399_v31 = vpop.xlane.xlu2 %398 }
 0x2a4   :  { %v855_v32 = vpop.eup %854  ;;  %856 = vrcp.f32 %v399_v31 }
 0x2a5   :  { %v342_v33 = vmul.f32 %v855_v32, %v1161_v51 }
 0x2a7   :  { %v343_v34 = vpack.c.bf16 %v342_v33, %v342_v33 }
 0x2a9   :  { %798 = vmatmul.msk.bf16.vlgmr.msrb.gmra.mxu2 %vm251_vm2, %v343_v34 }
 0x2aa   :  { %v857_v35 = vpop.eup %856 }
 0x2ab   :  { %v401_v36 = vmul.f32 %v857_v35, %v1165_v54  ;;  %v598_v37 = vpop.permute.xlu2 %597 }
 0x2ac   :  { %v603_v38 = vsel %vm286_vm3, %v598_v37, 0 }
 0x2ad   :  { %v402_v39 = vpack.c.bf16 %v401_v36, %v401_v36  ;;  %612 = vmatpush.bf16.msrb.mxu2 %v603_v38 }
 0x2af   :  { %800 = vmatmul.msk.bf16.vlgmr.msra.gmra.mxu0 %vm251_vm2, %v402_v39 }
 0x2b5   :  { %v455_v40 = vpop.xlane.xlu1 %454 }
 0x2b6   :  { %858 = vrcp.f32 %v455_v40  ;;  %v299_v41 = vpop.f32.mrf.mxu0 }
 0x2bc   :  { %v859_v42 = vpop.eup %858 }
 0x2bd   :  { %v457_v43 = vmul.f32 %v859_v42, %v845_v7  ;;  %v530_v44 = vpop.xlane.xlu1 %529  ;;  %v590_v45 = vpop.xlane.xlu0 %589 }
 0x2be   :  { %860 = vrcp.f32 %v530_v44  ;;  %v301_v46 = vpop.f32.mrf.mxu0 }
 0x2bf   :  { %v458_v47 = vpack.c.bf16 %v457_v43, %v457_v43  ;;  %862 = vrcp.f32 %v590_v45 }
 0x2c1   :  { %802 = vmatmul.msk.bf16.vlgmr.msra.gmra.mxu2 %vm251_vm2, %v458_v47 }
 0x2c4   :  { %v861_v48 = vpop.eup %860 }
 0x2c5   :  { %v532_v49 = vmul.f32 %v861_v48, %v847_v13  ;;  %v863_v51 = vpop.eup %862  ;;  %v649_v52 = vpop.xlane.xlu0 %648 }
 0x2c6   :  { %v592_v53 = vmul.f32 %v863_v51, %v849_v16  ;;  %864 = vrcp.f32 %v649_v52 }
 0x2c7   :  { %v533_v50 = vpack.c.bf16 %v532_v49, %v532_v49 }
 0x2c8   :  { %v593_v54 = vpack.c.bf16 %v592_v53, %v592_v53 }
 0x2c9   :  { %804 = vmatmul.msk.bf16.vlgmr.msrb.gmra.mxu0 %vm251_vm2, %v533_v50 }
 0x2cc   :  { %v865_v55 = vpop.eup %864 }
 0x2cd   :  { %v651_v56 = vmul.f32 %v865_v55, %v851_v19 }
 0x2cf   :  { %v652_v59 = vpack.c.bf16 %v651_v56, %v651_v56 }
 0x2d1   :  { %806 = vmatmul.msk.bf16.vlgmr.msrb.gmra.mxu2 %vm251_vm2, %v593_v54 }
 0x2d5   :  { %v654_v57 = vpop.permute.xlu1 %653 }
 0x2d6   :  { %v659_v58 = vsel %vm286_vm3, %v654_v57, 0 }
 0x2d7   :  { %668 = vmatpush.bf16.msra.mxu0 %v659_v58 }
 0x2d8   :  { %v710_v60 = vpop.permute.xlu0 %709 }
 0x2d9   :  { %v715_v61 = vsel %vm286_vm3, %v710_v60, 0 }
 0x2da   :  { %808 = vmatmul.msk.bf16.vlgmr.msra.gmra.mxu0 %vm251_vm2, %v652_v59  ;;  %724 = vmatpush.bf16.msra.mxu2 %v715_v61 }
 0x2f6   :  { %v705_v62 = vpop.xlane.xlu2 %704 }
 0x2f7   :  { %866 = vrcp.f32 %v705_v62 }
 0x2fd   :  { %v867_v63 = vpop.eup %866 }
 0x2fe   :  { %v707_v0 = vmul.f32 %v867_v63, %v853_v28 }
 0x300   :  { %v708_v1 = vpack.c.bf16 %v707_v0, %v707_v0 }
 0x302   :  { %810 = vmatmul.msk.bf16.vlgmr.msra.gmra.mxu2 %vm251_vm2, %v708_v1 }
 0x32c   :  { %v364_v2 = vpop.f32.mrf.mxu2  ;;  %v420_v3 = vpop.f32.mrf.mxu0 }
 0x32d   :  { %481 = vrot.lane.b32.xlu2 %v364_v2, %s1028_s26  ;;  %485 = vrot.lane.b32.xlu0 %v420_v3, %s1021_s10 }
 0x334   :  { %v366_v4 = vpop.f32.mrf.mxu2  ;;  %v422_v5 = vpop.f32.mrf.mxu0 }
 0x344   :  { %v476_v6 = vpop.f32.mrf.mxu2 }
 0x345   :  { %489 = vrot.lane.b32.xlu0 %v476_v6, %s1034_s7 }
 0x346   :  { %v549_v7 = vpop.f32.mrf.mxu0 }
 0x34c   :  { %v478_v8 = vpop.f32.mrf.mxu2 }
 0x34e   :  { %v551_v9 = vpop.f32.mrf.mxu0 }
 0x354   :  { %v614_v10 = vpop.f32.mrf.mxu2 }
 0x355   :  { %731 = vrot.lane.b32.xlu1 %v614_v10, %s1028_s26 }
 0x357   :  { %v670_v11 = vpop.f32.mrf.mxu0 }
 0x358   :  { %735 = vrot.lane.b32.xlu0 %v670_v11, %s1021_s10  ;;  %s1035_s10 = smov [#allocation13]  }
 0x359   :  { %s751_s17 = sshll.u32 %s1035_s10, 4  ;;  %s752_s17 = int_to_ptr.vmem [resolvable:$true] %s751_s17 }
 0x35c   :  { %v616_v12 = vpop.f32.mrf.mxu2 }
 0x35f   :  { %v672_v13 = vpop.f32.mrf.mxu0 }
 0x385   :  { %v726_v14 = vpop.f32.mrf.mxu2 }
 0x386   :  { %739 = vrot.lane.b32.xlu1 %v726_v14, %s1034_s7 }
 0x387   :  { %v482_v17 = vpop.permute.xlu2 %481 }
 0x388   :  { %v492_v18 = vsel %vm251_vm2, %v299_v41, %v482_v17 }
 0x38d   :  { %v728_v15 = vpop.f32.mrf.mxu2 }
 0x39f   :  { %v486_v16 = vpop.permute.xlu0 %485 }
 0x3a0   :  { %v494_v19 = vsel %vm493_vm4, %v492_v18, %v486_v16 }
 0x3b7   :  { %v490_v20 = vpop.permute.xlu0 %489 }
 0x3b8   :  { %v496_v21 = vsel %vm495_vm5, %v494_v19, %v490_v20 }
 0x3b9   :  { %497 = vst.msk [vmem:[#allocation13] sm:$0xff] %vm136_vm0, %v496_v21 }
 0x3c7   :  { %v732_v22 = vpop.permute.xlu1 %731 }
 0x3c8   :  { %v742_v24 = vsel %vm251_vm2, %v549_v7, %v732_v22 }
 0x3ca   :  { %v736_v23 = vpop.permute.xlu0 %735 }
 0x3cb   :  { %v743_v25 = vsel %vm493_vm4, %v742_v24, %v736_v23 }
 0x3f8   :  { %v740_v26 = vpop.permute.xlu1 %739 }
 0x3f9   :  { %v744_v27 = vsel %vm495_vm5, %v743_v25, %v740_v26 }
 0x3fa   :  { %746 = vst.msk [vmem:[#allocation13 + $0x8] sm:$0xff] %vm136_vm0, %v744_v27 }
 0x3fb   :  { %759 = dma.vmem_to_hbm [thread:$0]  %s752_s17, 256, %s754_s19, [#allocation6], %s1027_s3, %s1027_s3, %s1028_s26  }
 0x3fc   :  { %1018 = dma.done.wait [#allocation6], 256  }
 0x3fd   :  { %1019 = vsyncadd [#allocation6], 4294967040 }
 0x3fe   :  { %764 = vsyncpa [#allocation5], 1 }
 0x3ff   :  { %765 = vsyncpa [#allocation8], 1 }
 0x400   :  { %766 = vsyncpa [#allocation11], 1 }
 0x401   :  { %767 = vsyncpa [#allocation6], 1 }

</bundles_post_ra>
